<compile_context>
chip_gen: v7x
topology: tpu7x:2x2x1
jax: 0.10.0
libtpu: 0.0.40
codegen_flags: <defaults>
</compile_context>

<pallas_src>
import functools

import jax
import jax.numpy as jnp
from jax.experimental import pallas as pl
from jax.experimental.pallas import tpu as pltpu

PAD_SEARCH_SESSION_ID = 0  # const.PAD_SEARCH_SESSION_ID
PAD_ITEM_ID = 0            # const.PAD_ITEM_ID


def _src_session_feat_kernel(vq, vi,
                             qid_ref, ids_ref, qtab_ref, itab_ref,
                             qemb_ref, iemb_ref):
    """One row-tile: one-hot MXU gathers for query + all L item slots."""
    tdt = qtab_ref.dtype
    tn = qid_ref.shape[0]
    tnl = ids_ref.shape[0]          # == tn * L (ids pre-flattened in the wrapper)

    # --- query embedding: one-hot MXU gather.  Invalid sessions carry qid == -1
    #     (folded in by the wrapper), matching no column -> exact zero row. ---
    q_iota = jax.lax.broadcasted_iota(jnp.int32, (tn, vq), 1)
    q_oh = (qid_ref[...] == q_iota).astype(tdt)                       # (TN, VQ)
    qemb_ref[...] = jnp.dot(q_oh, qtab_ref[...],
                            preferred_element_type=jnp.float32)       # (TN, D)

    # --- item embeddings: all L slots fused into a single one-hot compare and a
    #     single MXU matmul (no per-slot loop, no cross-lane concatenate). ---
    i_iota = jax.lax.broadcasted_iota(jnp.int32, (tnl, vi), 1)
    i_oh = (ids_ref[...] == i_iota).astype(tdt)                       # (TN*L, VI)
    iemb_ref[...] = jnp.dot(i_oh, itab_ref[...],
                            preferred_element_type=jnp.float32)       # (TN*L, D)


def _pick_row_tile(n, l, vq, vi):
    """Row-tile ladder: amortize per-grid-step overhead while capping padding
    waste and the one-hot live set (~ tn * (vq + l*vi) * 4 bytes), and keep
    >= 2 grid steps so a 'parallel' axis feeds both v7x TensorCores."""
    budget = 6 * 1024 * 1024
    for tn in (512, 256, 128, 64, 32, 16, 8):
        if tn * (vq + l * vi) * 4 > budget:
            continue
        n_pad = -(-n // tn) * tn
        if n_pad - n > max(tn // 2, n // 4):     # cap padding waste
            continue
        if n_pad // tn < 2 and n > 8:            # keep >= 2 steps (megacore)
            continue
        return tn
    return 8


def _vmem_limit_bytes():
    """Generation-aware scoped-VMEM limit: ~3/4 of physical VMEM
    (v5e/v6e: 128 MiB -> 96 MiB; v7x: 64 MiB -> 48 MiB)."""
    cap = 64 * 1024 * 1024
    try:
        cap = int(pltpu.get_tpu_info().vmem_capacity_bytes)
    except Exception:
        pass
    return min(cap * 3 // 4, 96 * 1024 * 1024)


def src_session_feat(sample, map_query, map_pos_items, query_table, item_table):
    b, s = sample.shape
    n = b * s
    l = map_pos_items.shape[1]
    vq, d = query_table.shape
    vi, d2 = item_table.shape
    assert d == d2

    flat = sample.reshape(n).astype(jnp.int32)
    valid = flat != PAD_SEARCH_SESSION_ID                                # (N,)

    # Tiny exact-integer id-map lookups + the elementwise mask stay in XLA
    # (they fuse for free); the kernel only does the table gathers.
    qid = jnp.take(map_query.astype(jnp.int32), flat, axis=0)           # (N,)
    item_ids = jnp.take(map_pos_items.astype(jnp.int32), flat, axis=0)  # (N, L)
    item_mask = valid[:, None] & (item_ids != PAD_ITEM_ID)              # (N, L)

    # Fold validity into the gather ids: invalid rows get id -1 -> zero one-hot
    # -> exact zero embedding (removes the per-tile `* valid` broadcasts).
    qid_g = jnp.where(valid, qid, -1)
    ids_g = jnp.where(valid[:, None], item_ids, -1)

    tn = _pick_row_tile(n, l, vq, vi)
    n_pad = pl.cdiv(n, tn) * tn
    pad = n_pad - n
    if pad:
        qid_g = jnp.pad(qid_g, (0, pad), constant_values=-1)
        ids_g = jnp.pad(ids_g, ((0, pad), (0, 0)), constant_values=-1)

    # Pre-flatten item ids (free, row-major) so the kernel runs a single fused
    # (TN*L, VI) one-hot + one MXU matmul per tile.
    qid_g = qid_g.reshape(n_pad, 1)
    ids_flat = ids_g.reshape(n_pad * l, 1)

    # Tables: full-extent resident blocks, single-buffered (constant index_map
    # never needs a second pipeline buffer -> half the table VMEM).
    def table_spec(shape):
        return pl.BlockSpec(shape, lambda i: (0, 0), pipeline_mode=pl.Buffered(1))

    kernel = functools.partial(_src_session_feat_kernel, vq, vi)

    q_emb, i_emb = pl.pallas_call(
        kernel,
        grid=(n_pad // tn,),
        in_specs=[
            pl.BlockSpec((tn, 1), lambda i: (i, 0)),       # query ids
            pl.BlockSpec((tn * l, 1), lambda i: (i, 0)),   # flattened item ids
            table_spec((vq, d)),                           # query table (resident)
            table_spec((vi, d)),                           # item table  (resident)
        ],
        out_specs=(
            pl.BlockSpec((tn, d), lambda i: (i, 0)),       # query emb
            pl.BlockSpec((tn * l, d), lambda i: (i, 0)),   # item emb (row-major N*L)
        ),
        out_shape=(
            jax.ShapeDtypeStruct((n_pad, d), jnp.float32),
            jax.ShapeDtypeStruct((n_pad * l, d), jnp.float32),
        ),
        compiler_params=pltpu.CompilerParams(
            dimension_semantics=("parallel",),
            vmem_limit_bytes=_vmem_limit_bytes(),
        ),
    )(qid_g, ids_flat, query_table, item_table)

    result_query_emb = q_emb[:n].reshape(b, s, d)
    # (N*L, D) row-major == (N, L, D): free metadata reshape, no transpose.
    result_item_emb = i_emb[:n * l].reshape(b, s, l, d)
    result_item_mask = item_mask.reshape(b, s, l)
    return [result_query_emb, result_item_emb, result_item_mask]


def reference(sample, map_query, map_pos_items, query_table, item_table):
    b, s = sample.shape
    d = query_table.shape[1]
    l = map_pos_items.shape[1]
    flat = sample.reshape(-1)
    valid = flat != PAD_SEARCH_SESSION_ID
    qid = map_query[flat]
    items = map_pos_items[flat]
    qe = jnp.where(valid[:, None], query_table[qid], 0.0)
    ie = jnp.where(valid[:, None, None], item_table[items], 0.0)
    im = valid[:, None] & (items != PAD_ITEM_ID)
    return [qe.reshape(b, s, d), ie.reshape(b, s, l, d), im.reshape(b, s, l)]


if __name__ == "__main__":
    # Small synthetic shapes consistent with the module.
    B, S = 2, 8                # sample shape: (B, S) session ids
    L = 4                      # const.max_session_item_len
    D = 32                     # const.final_emb_size
    VS, VQ, VI = 64, 32, 48    # map-vocab / query-vocab / item-vocab sizes

    key = jax.random.PRNGKey(0)
    k_samp, k_mq, k_mi, k_qt, k_it = jax.random.split(key, 5)

    sample = jax.random.randint(k_samp, (B, S), 0, VS, dtype=jnp.int32)
    sample = sample.at[0, 0].set(PAD_SEARCH_SESSION_ID)   # guarantee a pad session
    map_query = jax.random.randint(k_mq, (VS,), 0, VQ, dtype=jnp.int32)
    map_pos_items = jax.random.randint(k_mi, (VS, L), 0, VI, dtype=jnp.int32)
    map_pos_items = map_pos_items.at[:, L - 1].set(PAD_ITEM_ID)  # some pad items
    query_table = jax.random.normal(k_qt, (VQ, D), dtype=jnp.float32)
    item_table = jax.random.normal(k_it, (VI, D), dtype=jnp.float32)

    outs = src_session_feat(sample, map_query, map_pos_items, query_table, item_table)
    outs = jax.block_until_ready(outs)

    refs = reference(sample, map_query, map_pos_items, query_table, item_table)
    assert jnp.allclose(outs[0], refs[0], atol=1e-6)
    assert jnp.allclose(outs[1], refs[1], atol=1e-6)
    assert jnp.array_equal(outs[2], refs[2])

    print("KERNEL_OK")
</pallas_src>

<mosaic_0001>
module attributes {stable_mosaic.version = 11 : i64} {
  func.func @_src_session_feat_kernel(%arg0: i32, %arg1: memref<8x1xi32, #tpu.memory_space<vmem>>, %arg2: memref<32x1xi32, #tpu.memory_space<vmem>>, %arg3: memref<32x32xf32, #tpu.memory_space<vmem>>, %arg4: memref<48x32xf32, #tpu.memory_space<vmem>>, %arg5: memref<8x32xf32, #tpu.memory_space<vmem>>, %arg6: memref<32x32xf32, #tpu.memory_space<vmem>>) attributes {dimension_semantics = [#tpu.dimension_semantics<parallel>], iteration_bounds = array<i64: 2>, scalar_prefetch = 0 : i64, scratch_operands = 0 : i64, tpu.core_type = #tpu.core_type<tc>, window_params = [{transform_indices = @transform_0, window_bounds = array<i64: 8, 1>}, {transform_indices = @transform_1, window_bounds = array<i64: 32, 1>}, {pipeline_mode = #tpu.pipeline_mode<synchronous>, transform_indices = @transform_2, window_bounds = array<i64: 32, 32>}, {pipeline_mode = #tpu.pipeline_mode<synchronous>, transform_indices = @transform_3, window_bounds = array<i64: 48, 32>}, {transform_indices = @transform_4, window_bounds = array<i64: 8, 32>}, {transform_indices = @transform_5, window_bounds = array<i64: 32, 32>}]} {
    %0 = tpu.iota {dimensions = array<i32: 1>} : vector<8x32xi32>
    %c0 = arith.constant 0 : index
    %c0_0 = arith.constant 0 : index
    %1 = vector.load %arg1[%c0, %c0_0] : memref<8x1xi32, #tpu.memory_space<vmem>>, vector<8x1xi32>
    %2 = vector.broadcast %1 : vector<8x1xi32> to vector<8x32xi32>
    %3 = arith.cmpi eq, %2, %0 : vector<8x32xi32>
    %4 = arith.extui %3 : vector<8x32xi1> to vector<8x32xi32>
    %5 = arith.sitofp %4 : vector<8x32xi32> to vector<8x32xf32>
    %c0_1 = arith.constant 0 : index
    %c0_2 = arith.constant 0 : index
    %6 = vector.load %arg3[%c0_1, %c0_2] : memref<32x32xf32, #tpu.memory_space<vmem>>, vector<32x32xf32>
    %cst = arith.constant dense<0.000000e+00> : vector<8x32xf32>
    %7 = tpu.matmul %5, %6, %cst {dimension_numbers = #tpu.dot_dimension_numbers<[1], [0], [0], [1], [0, 0, 1, 1], [], []>} : vector<8x32xf32>, vector<32x32xf32>, vector<8x32xf32> -> vector<8x32xf32>
    %c0_3 = arith.constant 0 : index
    %c0_4 = arith.constant 0 : index
    %8 = vector.load %arg5[%c0_3, %c0_4] : memref<8x32xf32, #tpu.memory_space<vmem>>, vector<8x32xf32>
    tpu.vector_store %arg5[%c0_3, %c0_4], %7 {strides = array<i32>} : memref<8x32xf32, #tpu.memory_space<vmem>>, vector<8x32xf32>,
    %9 = tpu.iota {dimensions = array<i32: 1>} : vector<32x48xi32>
    %c0_5 = arith.constant 0 : index
    %c0_6 = arith.constant 0 : index
    %10 = vector.load %arg2[%c0_5, %c0_6] : memref<32x1xi32, #tpu.memory_space<vmem>>, vector<32x1xi32>
    %11 = vector.broadcast %10 : vector<32x1xi32> to vector<32x48xi32>
    %12 = arith.cmpi eq, %11, %9 : vector<32x48xi32>
    %13 = arith.extui %12 : vector<32x48xi1> to vector<32x48xi32>
    %14 = arith.sitofp %13 : vector<32x48xi32> to vector<32x48xf32>
    %c0_7 = arith.constant 0 : index
    %c0_8 = arith.constant 0 : index
    %15 = vector.load %arg4[%c0_7, %c0_8] : memref<48x32xf32, #tpu.memory_space<vmem>>, vector<48x32xf32>
    %cst_9 = arith.constant dense<0.000000e+00> : vector<32x32xf32>
    %16 = tpu.matmul %14, %15, %cst_9 {dimension_numbers = #tpu.dot_dimension_numbers<[1], [0], [0], [1], [0, 0, 1, 1], [], []>} : vector<32x48xf32>, vector<48x32xf32>, vector<32x32xf32> -> vector<32x32xf32>
    %c0_10 = arith.constant 0 : index
    %c0_11 = arith.constant 0 : index
    %17 = vector.load %arg6[%c0_10, %c0_11] : memref<32x32xf32, #tpu.memory_space<vmem>>, vector<32x32xf32>
    tpu.vector_store %arg6[%c0_10, %c0_11], %16 {strides = array<i32>} : memref<32x32xf32, #tpu.memory_space<vmem>>, vector<32x32xf32>,
    return
  }
  func.func @transform_0(%arg0: i32) -> (i32, i32) {
    %c0_i32 = arith.constant 0 : i32
    %c0_i32_0 = arith.constant 0 : i32
    return %arg0, %c0_i32 : i32, i32
  }
  func.func @transform_1(%arg0: i32) -> (i32, i32) {
    %c0_i32 = arith.constant 0 : i32
    %c0_i32_0 = arith.constant 0 : i32
    return %arg0, %c0_i32 : i32, i32
  }
  func.func @transform_2(%arg0: i32) -> (i32, i32) {
    %c0_i32 = arith.constant 0 : i32
    %c0_i32_0 = arith.constant 0 : i32
    %c0_i32_1 = arith.constant 0 : i32
    return %c0_i32, %c0_i32_0 : i32, i32
  }
  func.func @transform_3(%arg0: i32) -> (i32, i32) {
    %c0_i32 = arith.constant 0 : i32
    %c0_i32_0 = arith.constant 0 : i32
    %c0_i32_1 = arith.constant 0 : i32
    return %c0_i32, %c0_i32_0 : i32, i32
  }
  func.func @transform_4(%arg0: i32) -> (i32, i32) {
    %c0_i32 = arith.constant 0 : i32
    %c0_i32_0 = arith.constant 0 : i32
    return %arg0, %c0_i32 : i32, i32
  }
  func.func @transform_5(%arg0: i32) -> (i32, i32) {
    %c0_i32 = arith.constant 0 : i32
    %c0_i32_0 = arith.constant 0 : i32
    return %arg0, %c0_i32 : i32, i32
  }
}

</mosaic_0001>

<bundles_post_ra>
// kernel: tpu_custom_call.1
= control target key start
LH: loop header
LB: loop body
LE: loop exit
PB: predicated region body
PF: predicated region fallthrough
CT: control target
= control target key end

     0   :  { %11 = vsyncpa [#allocation3], 0  ;;  %s989_s0 = inlined_call_operand.vmem [shape: s32[16,1], index: 0, kind: input, shape index: {}]   ;;  %s990_s1 = inlined_call_operand.vmem [shape: s32[64,1], index: 1, kind: input, shape index: {}]   ;;  %s991_s2 = inlined_call_operand.vmem [shape: f32[32,32], index: 2, kind: input, shape index: {}]   ;;  %s992_s3 = inlined_call_operand.vmem [shape: f32[48,32], index: 3, kind: input, shape index: {}]   ;;  %s993_s4 = inlined_call_operand.hbm [shape: f32[16,32], index: 4, kind: output, shape index: {0}]   ;;  %s994_s5 = inlined_call_operand.vmem [shape: f32[64,32], index: 5, kind: output, shape index: {1}]  }
   0x1   :  { %13 = vsyncpa [#allocation3 + $0x1], 0  ;;  %s829_s18 = smov 0   ;;  %s831_s19 = smov 0  }
   0x2   :  { %s833_s20 = smov 0   ;;  %s835_s21 = smov 0  }
   0x3 LB: > { %s850_s22 = sadd.s32 4294967295, %s792_s21   ;;  %s599_s23 = sadd.s32 4294967294, %s792_s21   ;;  %s792_s21 = sphi %s835_s21, %s1000_s21   ;;  %s788_s20 = sphi %s833_s20, %s999_s20   ;;  %s784_s19 = sphi %s831_s19, %s998_s19   ;;  %s780_s18 = sphi %s829_s18, %s997_s18  }
   0x4   : > { %s854_s24 = sadd.s32 1, %s792_s21   ;;  %s120_s25 = sadd.s32 1, %s788_s20 }
   0x5   : > { %s117_s26 = ssub.s32 %s792_s21, %s854_s24  ;;  %p130_p0 = scmp.ne.s32.totalorder %s788_s20, %s784_s19 }
   0x6   : > { %p118_p1 = scmp.eq.s32.totalorder %s117_s26, 0  ;;  %p131_p2 = scmp.eq.s32.totalorder %s850_s22, 1 }
   0x7   : > { %p136_p3 = scmp.ne.s32.totalorder %s784_s19, %s780_s18  ;;  %p137_p4 = scmp.eq.s32.totalorder %s599_s23, 1 }
   0x8   : > { %s865_s27 = scalar_select %p118_p1, %s788_s20, %s120_s25  }
   0x9   : > { %p867_p5 = por %p131_p2, %p130_p0  ;;  %p871_p6 = por %p137_p4, %p136_p3 }
   0xa   : > { %p602_p7 = scmp.ge.s32.totalorder %s792_s21, 1  ;;  %p203_p8 = scmp.lt.s32.totalorder %s792_s21, 3 }
   0xc   : > { %p204_p9 = pnand %p602_p7, %p203_p8 }
   0xd   : > { %s605_s30 = sshll.u32 (!%p204_p9), %s850_s22, 2  ;;  %p240_p10 = scmp.lt.s32.totalorder (!%p204_p9), %s850_s22, 1  ;;  %v372_v0 = vld [vmem:[%s992_s3] sm:$0xff] (!%p204_p9)  ;;  %v373_v1 = vld [vmem:[%s992_s3 + $0x8] sm:$0xff] (!%p204_p9)  ;;  %v374_v2 = vld [vmem:[%s992_s3 + $0x10] sm:$0xff] (!%p204_p9)  ;;  %v794_v3 = vmov (!%p204_p9), 0   ;;  %v256_v23 = vlaneseq (!%p204_p9) }
   0xe   : > { %207 = sbr.rel (%p204_p9) target bundleno = 391 (0x187), region = 36  ;;  %729 = vset.pattern.permute.xlu1 (!%p204_p9), %v794_v3  ;;  %728 = vset.pattern.permute.xlu0 (!%p204_p9), %v794_v3  ;;  %p245_p11 = scmp.lt.s32.totalorder (!%p204_p9), %s605_s30, 7  ;;  %v673_v4 = vpack.c.bf16 (!%p204_p9), %v373_v1, %v372_v0  ;;  %v375_v5 = vld [vmem:[%s992_s3 + $0x18] sm:$0xff] (!%p204_p9)  ;;  %v376_v10 = vld [vmem:[%s992_s3 + $0x20] sm:$0xff] (!%p204_p9)  ;;  %v377_v11 = vld [vmem:[%s992_s3 + $0x28] sm:$0xff] (!%p204_p9)  ;;  %v795_v16 = vmov (!%p204_p9), 0.0|0.0  }
   0xf   : > { %v677_v6 = vpack.c.bf16 (!%p204_p9), %v375_v5, %v374_v2  ;;  %v681_v13 = vpack.c.bf16 (!%p204_p9), %v377_v11, %v376_v10  ;;  %v265_v14 = vld [vmem:[%s991_s2] sm:$0xff] (!%p204_p9)  ;;  %v266_v15 = vld [vmem:[%s991_s2 + $0x8] sm:$0xff] (!%p204_p9)  ;;  %667 = vmatprep.subr.bf16.mxu0 (!%p204_p9), %v795_v16  ;;  %v267_v18 = vld [vmem:[%s991_s2 + $0x10] sm:$0xff] (!%p204_p9)  ;;  %vm796_vm0 = vmmov (!%p204_p9), 0   ;;  %v797_v22 = vmov (!%p204_p9), 0.0   ;;  %s620_s11 = sshll.u32 (!%p204_p9), %s850_s22, 7 }
  0x10   : > { %674 = vmatprep.subr.bf16.mxu1 (!%p204_p9), %v673_v4  ;;  %v668_v17 = vpack.c.bf16 (!%p204_p9), %v266_v15, %v265_v14  ;;  %v268_v19 = vld [vmem:[%s991_s2 + $0x18] sm:$0xff] (!%p204_p9)  ;;  %646 = vmatprep.mubr.msk.f32.mxu0 (!%p204_p9), %vm796_vm0, %v797_v22  ;;  %v257_v24 = vand.u32 (!%p204_p9), 127, %v256_v23  ;;  %vm378_vm1 = vcmask (!%p204_p9), 392192   ;;  %vm269_vm6 = vcmask (!%p204_p9), 261120   ;;  %s798_s17 = smov (!%p204_p9), [#allocation2]  }
  0x11   : > { %676 = vmatpush3.bf16.msra.mxu1 (!%p204_p9), %v673_v4  ;;  %v671_v21 = vpack.c.bf16 (!%p204_p9), %v268_v19, %v267_v18 }
  0x12   : > { %678 = vmatprep.subr.bf16.mxu1 (!%p204_p9), %v677_v6  ;;  %669 = vmatpush3.bf16.msra.mxu0 (!%p204_p9), %v668_v17 }
  0x13   : > { %670 = vmatprep.subr.bf16.mxu0 (!%p204_p9), %v795_v16 }
  0x15   : > { %s241_s14 = scalar_select %p240_p10, %s850_s22, 1  ;;  %680 = vmatpush3.bf16.msra.mxu1 %v677_v6 }
  0x16   : > { %s1002_s30 = smov (!%p245_p11, %s605_s30), 7  ;;  %682 = vmatprep.subr.bf16.mxu1 %v681_v13  ;;  %672 = vmatpush3.bf16.msra.mxu0 %v671_v21 }
  0x17   : > { %s606_s15 = sshll.u32 %s1002_s30, 3  ;;  %s604_s25 = sshll.u32 %s241_s14, 3 }
  0x18   : > { %s248_s23 = scalar_lea.vmem %s990_s1, %s606_s15  ;;  %s243_s16 = scalar_lea.vmem %s989_s0, %s604_s25 }
  0x19   : > { %v346_v7 = vld [vmem:[%s248_s23 + $0x10] sm:$0xff]  ;;  %v344_v8 = vld [vmem:[%s248_s23] sm:$0xff]  ;;  %v347_v9 = vld [vmem:[%s248_s23 + $0x18] sm:$0xff]  ;;  %684 = vmatpush3.bf16.msra.mxu1 %v681_v13  ;;  %s230_s25 = sand.u32 1, %s784_s19   ;;  %s932_s10 = scalar_lea.vmem %s994_s5, %s606_s15 }
  0x1a   : > { %355 = vperm.xlu1 %729, %v346_v7   ;;  %349 = vperm.xlu0 %728, %v344_v8   ;;  %v345_v12 = vld [vmem:[%s248_s23 + $0x8] sm:$0xff]  ;;  %v258_v20 = vld [vmem:[%s243_s16] sm:$0xff]  ;;  %s603_s7 = sshll.u32 %s230_s25, 3  ;;  %s942_s16 = scalar_lea.hbm %s993_s4, %s620_s11 }
  0x1b   : > { %s232_s12 = scalar_lea.vmem [#allocation2], %s603_s7  ;;  %s481_s22 = scalar_lea.sflag [#allocation3], %s230_s25 }
  0x1c   : > { %s499_s13 = sshll.u32 %s232_s12, 4  ;;  %s734_s23 = sshll.u32 %s798_s17, 4  ;;  %s944_s13 = int_to_ptr.vmem [resolvable:$true] %s499_s13  ;;  %s735_s23 = int_to_ptr.vmem [resolvable:$false] %s734_s23 }
  0x1d   : > { %s730_s15 = scalar_lea.vmem %s944_s13, 128  ;;  %s736_s26 = scalar_lea.vmem %s735_s23, 256 }
  0x1e   : > { %358 = vperm.xlu1 %729, %v347_v9   ;;  %352 = vperm.xlu0 %728, %v345_v12   ;;  %p731_p12 = scmp.ne.s32.totalorder %s944_s13, %s730_s15  ;;  %p737_p1 = scmp.lt.s32.totalorder %s944_s13, %s735_s23 }
  0x1f   : > { %p738_p2 = scmp.lt.s32.totalorder %s736_s26, %s730_s15 }
  0x20   : > { %p732_p13 = pnand %p731_p12, %p867_p5 }
  0x21   : > { %p739_p3 = por %p738_p2, %p737_p1 }
  0x22   : > { %260 = vperm.xlu0 %728, %v258_v20   ;;  %p733_p0 = pneg %p732_p13 }
  0x24   : > { %p740_p4 = pnand %p739_p3, %p733_p0 }
  0x99   : > { %v356_v25 = vpop.permute.xlu1 %355  ;;  %v350_v26 = vpop.permute.xlu0 %349 }
  0x9a   : > { %vm360_vm2 = vcmp.eq.s32.totalorder %v350_v26, %v257_v24  ;;  %vm362_vm3 = vcmp.eq.s32.totalorder %v356_v25, %v257_v24 }
  0x9b   : > { %v611_v27 = vsel %vm360_vm2, 1.0, %v797_v22  ;;  %v613_v30 = vsel %vm362_vm3, 1.0, %v797_v22 }
  0x9c   : > { %661 = vmatprep.mubr.msk.f32.mxu1 %vm378_vm1, %v611_v27 }
  0x9d   : > { %v359_v28 = vpop.permute.xlu1 %358  ;;  %v353_v29 = vpop.permute.xlu0 %352 }
  0x9e   : > { %vm361_vm4 = vcmp.eq.s32.totalorder %v353_v29, %v257_v24  ;;  %vm363_vm5 = vcmp.eq.s32.totalorder %v359_v28, %v257_v24 }
  0x9f   : > { %v612_v31 = vsel %vm361_vm4, 1.0, %v797_v22  ;;  %v614_v33 = vsel %vm363_vm5, 1.0, %v797_v22 }
  0xa0   : > { %662 = vmatmul.mubr.msk.f32.vlgmr.msra.gmra.mrb[0].mxu1 %vm378_vm1, %v612_v31 }
  0xa1   : > { %664 = vmatprep.mubr.msk.f32.mxu1 %vm378_vm1, %v613_v30  ;;  %v261_v32 = vpop.permute.xlu0 %260 }
  0xa2   : > { %vm262_vm7 = vcmp.eq.s32.totalorder %v261_v32, %v257_v24 }
  0xa3   : > { %v609_v34 = vsel %vm262_vm7, 1.0, %v797_v22 }
  0xa4   : > { %647 = vmatmul.mubr.msk.f32.vlgmr.msra.gmra.mrb[0].mxu0 %vm269_vm6, %v609_v34  ;;  %665 = vmatmul.mubr.msk.f32.gmra.mrb[2].mxu1 %vm378_vm1, %v614_v33 }
 0x173   : > { %v663_v35 = vpop.f32.mrb[0].mxu1 }
 0x174   : > { %v457_v36 = vpop.f32.mrb[1].mxu1  ;;  %477 = vst.msk [vmem:[%s932_s10 + $0x8] sm:$0xff] %vm269_vm6, %v663_v35 }
 0x175   : > { %476 = vst.msk [vmem:[%s932_s10] sm:$0xff] %vm269_vm6, %v457_v36 }
 0x177   : > { %v339_v37 = vpop.f32.mrb[0].mxu0  ;;  %v666_v38 = vpop.f32.mrb[2].mxu1 }
 0x178   : > { %343 = vst.msk [vmem:[%s232_s12] sm:$0xff] %vm269_vm6, %v339_v37  ;;  %v648_v39 = vpop.f32.mrb[1].mxu0  ;;  %v467_v40 = vpop.f32.mrb[3].mxu1 }
 0x179   : > { %478 = vst.msk [vmem:[%s932_s10 + $0x10] sm:$0xff] %vm269_vm6, %v467_v40 }
 0x17a   : > { %743 = shalt.err (!%p740_p4)
}
 0x17b   : > { %s744_s6 = scalar_lea.hbm %s942_s16, 128  ;;  %s748_s8 = scalar_lea.hbm %s993_s4, 256 }
 0x17c   : > { %p745_p7 = scmp.ne.s32.totalorder %s942_s16, %s744_s6  ;;  %p749_p10 = scmp.lt.u32.totalorder %s942_s16, %s993_s4 }
 0x17d   : > { %p750_p11 = scmp.lt.u32.totalorder %s748_s8, %s744_s6  ;;  %p752_p13 = scmp.lt.u32.totalorder %s744_s6, %s942_s16 }
 0x17e   : > { %p746_p8 = pnand %p745_p7, %p867_p5 }
 0x17f   : > { %p751_p12 = por %p750_p11, %p749_p10 }
 0x180   : > { %p747_p9 = pneg %p746_p8 }
 0x181   : > { %p753_p0 = por %p752_p13, %p751_p12 }
 0x183   : > { %p754_p1 = pnand %p753_p0, %p747_p9 }
 0x185   : > { %757 = shalt.err (!%p754_p1)
}
 0x186   : > { %685 = dma.vmem_to_hbm [thread:$0]  (%p867_p5), %s944_s13, 128, %s942_s16, %s481_s22   ;;  %479 = vst.msk [vmem:[%s932_s10 + $0x18] sm:$0xff] %vm269_vm6, %v666_v38 }
 0x187 PF: > { %p691_p2 = scmp.ge.s32.totalorder %s792_s21, 2  ;;  %s515_s12 = sand.u32 1, %s780_s18  }
 0x188   : > { %s516_s14 = scalar_lea.sflag [#allocation3], %s515_s12 }
 0x189   : > { %p688_p3 = pnand %p691_p2, %p871_p6 }
 0x18b   : > { %775 = dma.done.wait (!%p688_p3), %s516_s14, 128  }
 0x18c   : > { %777 = vsyncadd (!%p688_p3), %s516_s14, 4294967168  ;;  %p16_p4 = scmp.ge.s32.totalorder %s854_s24, 4   ;;  %s997_s18 = smov %s784_s19 }
 0x18d   : > { %s998_s19 = smov %s788_s20  ;;  %s999_s20 = smov %s865_s27 }
 0x18e   : > { %s1000_s21 = smov %s854_s24  ;;  %18 = sbr.rel (!%p16_p4) target bundleno = 3 (0x3), region = 86 }
 0x195   :  { %529 = vsyncpa [#allocation3], 1 }
 0x196   :  { %531 = vsyncpa [#allocation3 + $0x1], 1 }

</bundles_post_ra>
